<compile_context>
chip_gen: v6e
topology: v6e:2x2x1
jax: 0.10.0
libtpu: 0.0.40
codegen_flags: <defaults>
</compile_context>

<pallas_src>
import jax
import jax.numpy as jnp
from jax import lax
from jax.experimental import pallas as pl
from jax.experimental.pallas import tpu as pltpu


# ----------------------------------------------------------------------------
# Fused encode kernel: for one batch row, run `steps` matching-pursuit iterations
# entirely in VMEM:
#   correlation (MXU, bf16) -> global top-1 -> residual update -> embedding row
# ----------------------------------------------------------------------------
def _make_encode_kernel(A, K, F, t_tile, n_t, N, steps):
    # soft_dirac forward == argmax.  Applied to a vector that is zero everywhere
    # except `val` at `idx`, the selected index is `idx` when val > 0, 0 when
    # val == 0, and the first zero entry when val < 0.
    neg_t_idx = min(1, N - 1)
    neg_a_idx = min(1, A - 1)
    pos_scale = 20.0 / float(max(N - 1, 1))
    big_flat = A * t_tile
    n_groups = K // 8
    W = 2 * t_tile
    t_shift = t_tile.bit_length() - 1           # t_tile is a power of two
    t_mask = t_tile - 1

    def kernel(res_in_ref, dict_bf_ref, dict_pad_ref, emb_ref,
               emb_out_ref, res_out_ref, res_scr):
        # ---- residual -> VMEM once per encode; row n_t is the zero look-ahead pad ----
        res_scr[0:n_t, :] = res_in_ref[...]
        res_scr[pl.ds(n_t, 1), :] = jnp.zeros((1, t_tile), jnp.float32)

        # flattened (atom-major) index grid, hoisted out of the loops
        flat_iota = (lax.broadcasted_iota(jnp.int32, (A, t_tile), 0) * t_tile
                     + lax.broadcasted_iota(jnp.int32, (A, t_tile), 1))

        def tile_body(i, carry):
            bv, ba, bt = carry
            cur = res_scr[pl.ds(i, 1), :]                        # (1, T)
            nxt = res_scr[pl.ds(i + 1, 1), :]                    # (1, T) look-ahead
            w = jnp.concatenate([cur, nxt], axis=1)              # (1, 2T)

            # shifted-window operand built in vregs (no per-row masked stores):
            #   stage 1: 8 static lane rolls  -> s8[q, j] = w[j + q]
            srows = [w] + [pltpu.roll(w, W - q, axis=1) for q in range(1, 8)]
            s8 = jnp.concatenate(srows, axis=0)                  # (8, 2T)
            #   stage 2: K/8 grouped lane slices -> m[8p+q, j] = w[j + 8p + q]
            blocks = [s8[:, 8 * p: 8 * p + t_tile] for p in range(n_groups)]
            m = jnp.concatenate(blocks, axis=0)                  # (K, T)

            # MXU correlation: fm[a, j] = sum_k dict[a, k] * res[i*T + j + k]
            fm = jnp.dot(dict_bf_ref[...], m.astype(jnp.bfloat16),
                         preferred_element_type=jnp.float32)     # (A, T) f32

            # in-tile top-1 (first occurrence in (atom, time) order), one masked pass
            vmax = jnp.max(fm, keepdims=True)                    # (1, 1)
            flat = jnp.min(jnp.where(fm == vmax, flat_iota, big_flat),
                           keepdims=True)                        # (1, 1) i32
            a_i = jnp.right_shift(flat, t_shift)
            t_i = jnp.bitwise_and(flat, t_mask) + i * t_tile     # global sample index

            better = (vmax > bv) | ((vmax == bv) &
                                    ((a_i < ba) | ((a_i == ba) & (t_i < bt))))
            bv = jnp.where(better, vmax, bv)
            ba = jnp.where(better, a_i, ba)
            bt = jnp.where(better, t_i, bt)
            return bv, ba, bt

        def step_body(s, carry):
            init = (jnp.full((1, 1), -jnp.inf, jnp.float32),
                    jnp.zeros((1, 1), jnp.int32),
                    jnp.zeros((1, 1), jnp.int32))
            bv, ba, bt = lax.fori_loop(0, n_t, tile_body, init)

            val_s = bv[0, 0]                                     # scalars
            a_s = ba[0, 0]
            t_s = bt[0, 0]

            # ---- matching-pursuit residual update with the RAW argmax (a*, t*, val) ----
            atom = dict_pad_ref[pl.ds(a_s, 1), :]                # (1, T) f32, zeros past K
            upd = jnp.concatenate(
                [atom * val_s, jnp.zeros((1, t_tile), jnp.float32)], axis=1)  # (1, 2T)
            r = jnp.right_shift(t_s, t_shift)                    # tile row of t*
            o = jnp.bitwise_and(t_s, t_mask)                     # lane offset of t*
            upd = pltpu.roll(upd, o, axis=1)                     # dynamic lane rotate
            res_scr[pl.ds(r, 1), :] = res_scr[pl.ds(r, 1), :] - upd[:, :t_tile]
            res_scr[pl.ds(r + 1, 1), :] = (res_scr[pl.ds(r + 1, 1), :]
                                           - upd[:, t_tile:])
            # truncate like conv[:N]: anything written past N is discarded
            res_scr[pl.ds(n_t, 1), :] = jnp.zeros((1, t_tile), jnp.float32)

            # ---- soft_dirac forward == argmax: packed [position, value, atom emb] ----
            def dirac_index(idx, fallback):
                neg = jnp.where(idx == 0, fallback, 0)
                return jnp.where(val_s > 0.0, idx,
                                 jnp.where(val_s < 0.0, neg, 0))

            pos_idx = dirac_index(t_s, neg_t_idx)
            aemb_idx = dirac_index(a_s, neg_a_idx)
            position = pos_idx.astype(jnp.float32) * pos_scale

            aemb = emb_ref[pl.ds(aemb_idx, 1), :]                # (1, F), cols 0,1 zero
            col = lax.broadcasted_iota(jnp.int32, (1, F), 1)
            row = jnp.where(col == 0, position,
                            jnp.where(col == 1, val_s, aemb))
            emb_out_ref[pl.ds(s, 1), :] = row
            return carry

        lax.fori_loop(0, steps, step_body, 0)
        res_out_ref[...] = res_scr[0:n_t, :]

    return kernel


def encode(x, dictionary, emb_table, steps, t_tile=512):
    """Single-band matching-pursuit encode; returns ((B, steps, 2+E), (B, N))."""
    B, N = x.shape
    A, K = dictionary.shape
    E = emb_table.shape[1]
    F = E + 2
    assert t_tile & (t_tile - 1) == 0 and t_tile % 128 == 0
    assert N % t_tile == 0, "n_samples must be a multiple of t_tile"
    assert K <= t_tile and K % 8 == 0
    n_t = N // t_tile

    emb_pad = jnp.pad(emb_table, ((0, 0), (2, 0)))               # (A, 2+E), cols 0,1 = 0
    dict_bf = dictionary.astype(jnp.bfloat16)                    # MXU operand
    dict_pad = jnp.pad(dictionary, ((0, 0), (0, t_tile - K)))    # (A, t_tile) f32
    res3 = x.reshape(B, n_t, t_tile)

    kernel = _make_encode_kernel(A, K, F, t_tile, n_t, N, steps)
    emb, res = pl.pallas_call(
        kernel,
        out_shape=(
            jax.ShapeDtypeStruct((B, steps, F), jnp.float32),
            jax.ShapeDtypeStruct((B, n_t, t_tile), jnp.float32),
        ),
        grid=(B,),
        in_specs=[
            pl.BlockSpec((None, n_t, t_tile), lambda b: (b, 0, 0)),   # residual row
            pl.BlockSpec((A, K), lambda b: (0, 0)),                   # bf16 dictionary
            pl.BlockSpec((A, t_tile), lambda b: (0, 0)),              # f32 padded dictionary
            pl.BlockSpec((A, F), lambda b: (0, 0)),                   # padded emb table
        ],
        out_specs=(
            pl.BlockSpec((None, steps, F), lambda b: (b, 0, 0)),
            pl.BlockSpec((None, n_t, t_tile), lambda b: (b, 0, 0)),
        ),
        scratch_shapes=[
            pltpu.VMEM((n_t + 1, t_tile), jnp.float32),               # resident residual
        ],
        compiler_params=pltpu.CompilerParams(
            dimension_semantics=("parallel",),
            # budgeted for v7x's 64 MiB per-TC VMEM (v5e/v6e have 128 MiB)
            vmem_limit_bytes=48 * 1024 * 1024,
        ),
    )(res3, dict_bf, dict_pad, emb_pad)
    return emb, res.reshape(B, N)


# ----------------------------------------------------------------------------
# Loss reduction: mse(ae, be) + mean(| ||a_res|| - ||b_res|| |), single launch
# ----------------------------------------------------------------------------
def sparse_coding_loss_reduce(ae, be, a_res, b_res):
    B, S, F = ae.shape
    ae2 = ae.reshape(B, S * F)
    be2 = be.reshape(B, S * F)
    inv_total = 1.0 / float(B * S * F)
    inv_b = 1.0 / float(B)

    def kernel(ae_ref, be_ref, ar_ref, br_ref, o_ref):
        d = ae_ref[...] - be_ref[...]                                  # (B, S*F)
        mse = jnp.sum(jnp.sum(d * d, axis=1, keepdims=True),
                      axis=0, keepdims=True)                           # (1, 1)
        an = jnp.sqrt(jnp.sum(ar_ref[...] * ar_ref[...], axis=1, keepdims=True))
        bn = jnp.sqrt(jnp.sum(br_ref[...] * br_ref[...], axis=1, keepdims=True))
        nt = jnp.sum(jnp.abs(an - bn), axis=0, keepdims=True)          # (1, 1)
        o_ref[...] = mse * inv_total + nt * inv_b

    out = pl.pallas_call(
        kernel,
        out_shape=jax.ShapeDtypeStruct((1, 1), jnp.float32),
    )(ae2, be2, a_res, b_res)
    return out[0, 0]


def sparse_coding_loss(a, b, dictionary, emb_table, steps, t_tile=512):
    B = a.shape[0]
    # encode a and b in one launch: batch axis is "parallel" (feeds both v7x cores)
    x = jnp.concatenate([a, b], axis=0)
    emb, res = encode(x, dictionary, emb_table, steps, t_tile)
    # TODO(synk): external CanonicalOrdering replaced by identity ordering.
    ae, be = emb[:B], emb[B:]
    a_res, b_res = res[:B], res[B:]
    return sparse_coding_loss_reduce(ae, be, a_res, b_res)


if __name__ == "__main__":
    # small synthetic shapes (module implies n_samples >> kernel_size; scaled down)
    B, N, A, K, E, STEPS, T_TILE = 2, 256, 16, 32, 30, 4, 128

    key = jax.random.PRNGKey(0)
    k1, k2, k3, k4 = jax.random.split(key, 4)
    a = jax.random.normal(k1, (B, N), jnp.float32)
    b = jax.random.normal(k2, (B, N), jnp.float32)

    # deterministic "parameters": unit-norm dictionary atoms + atom embedding table
    dictionary = jax.random.normal(k3, (A, K), jnp.float32)
    dictionary = dictionary / jnp.linalg.norm(dictionary, axis=-1, keepdims=True)
    emb_table = 0.1 * jax.random.normal(k4, (A, E), jnp.float32)

    loss_fn = jax.jit(sparse_coding_loss, static_argnames=("steps", "t_tile"))
    loss = loss_fn(a, b, dictionary, emb_table, steps=STEPS, t_tile=T_TILE)
    jax.block_until_ready(loss)
    print("KERNEL_OK")
</pallas_src>

<mosaic_0001>
module attributes {stable_mosaic.version = 11 : i64} {
  func.func @kernel(%arg0: memref<2x128xf32, #tpu.memory_space<vmem>>, %arg1: memref<2x128xf32, #tpu.memory_space<vmem>>, %arg2: memref<2x256xf32, #tpu.memory_space<vmem>>, %arg3: memref<2x256xf32, #tpu.memory_space<vmem>>, %arg4: memref<1x1xf32, #tpu.memory_space<vmem>>) attributes {dimension_semantics = [], scalar_prefetch = 0 : i64, scratch_operands = 0 : i64, tpu.core_type = #tpu.core_type<tc>} {
    %c0 = arith.constant 0 : index
    %c0_0 = arith.constant 0 : index
    %0 = vector.load %arg0[%c0, %c0_0] : memref<2x128xf32, #tpu.memory_space<vmem>>, vector<2x128xf32>
    %c0_1 = arith.constant 0 : index
    %c0_2 = arith.constant 0 : index
    %1 = vector.load %arg1[%c0_1, %c0_2] : memref<2x128xf32, #tpu.memory_space<vmem>>, vector<2x128xf32>
    %2 = arith.subf %0, %1 : vector<2x128xf32>
    %3 = arith.mulf %2, %2 : vector<2x128xf32>
    %cst = arith.constant dense<0.000000e+00> : vector<2xf32>
    %4 = vector.multi_reduction <add>, %3, %cst [1] : vector<2x128xf32> to vector<2xf32>
    %5 = vector.shape_cast %4 : vector<2xf32> to vector<2x1xf32>
    %cst_3 = arith.constant dense<0.000000e+00> : vector<1xf32>
    %6 = vector.multi_reduction <add>, %5, %cst_3 [0] : vector<2x1xf32> to vector<1xf32>
    %7 = vector.shape_cast %6 : vector<1xf32> to vector<1x1xf32>
    %c0_4 = arith.constant 0 : index
    %c0_5 = arith.constant 0 : index
    %8 = vector.load %arg2[%c0_4, %c0_5] : memref<2x256xf32, #tpu.memory_space<vmem>>, vector<2x256xf32>
    %c0_6 = arith.constant 0 : index
    %c0_7 = arith.constant 0 : index
    %9 = vector.load %arg2[%c0_6, %c0_7] : memref<2x256xf32, #tpu.memory_space<vmem>>, vector<2x256xf32>
    %10 = arith.mulf %8, %9 : vector<2x256xf32>
    %cst_8 = arith.constant dense<0.000000e+00> : vector<2xf32>
    %11 = vector.multi_reduction <add>, %10, %cst_8 [1] : vector<2x256xf32> to vector<2xf32>
    %12 = vector.shape_cast %11 : vector<2xf32> to vector<2x1xf32>
    %13 = math.sqrt %12 : vector<2x1xf32>
    %c0_9 = arith.constant 0 : index
    %c0_10 = arith.constant 0 : index
    %14 = vector.load %arg3[%c0_9, %c0_10] : memref<2x256xf32, #tpu.memory_space<vmem>>, vector<2x256xf32>
    %c0_11 = arith.constant 0 : index
    %c0_12 = arith.constant 0 : index
    %15 = vector.load %arg3[%c0_11, %c0_12] : memref<2x256xf32, #tpu.memory_space<vmem>>, vector<2x256xf32>
    %16 = arith.mulf %14, %15 : vector<2x256xf32>
    %cst_13 = arith.constant dense<0.000000e+00> : vector<2xf32>
    %17 = vector.multi_reduction <add>, %16, %cst_13 [1] : vector<2x256xf32> to vector<2xf32>
    %18 = vector.shape_cast %17 : vector<2xf32> to vector<2x1xf32>
    %19 = math.sqrt %18 : vector<2x1xf32>
    %20 = arith.subf %13, %19 : vector<2x1xf32>
    %21 = math.absf %20 : vector<2x1xf32>
    %cst_14 = arith.constant dense<0.000000e+00> : vector<1xf32>
    %22 = vector.multi_reduction <add>, %21, %cst_14 [0] : vector<2x1xf32> to vector<1xf32>
    %23 = vector.shape_cast %22 : vector<1xf32> to vector<1x1xf32>
    %cst_15 = arith.constant 3.906250e-03 : f32
    %24 = vector.broadcast %cst_15 : f32 to vector<1x1xf32>
    %25 = arith.mulf %7, %24 : vector<1x1xf32>
    %cst_16 = arith.constant 5.000000e-01 : f32
    %26 = vector.broadcast %cst_16 : f32 to vector<1x1xf32>
    %27 = arith.mulf %23, %26 : vector<1x1xf32>
    %28 = arith.addf %25, %27 : vector<1x1xf32>
    %c0_17 = arith.constant 0 : index
    %c0_18 = arith.constant 0 : index
    %29 = vector.load %arg4[%c0_17, %c0_18] : memref<1x1xf32, #tpu.memory_space<vmem>>, vector<1x1xf32>
    tpu.vector_store %arg4[%c0_17, %c0_18], %28 {strides = array<i32>} : memref<1x1xf32, #tpu.memory_space<vmem>>, vector<1x1xf32>,
    return
  }
}

module attributes {stable_mosaic.version = 11 : i64} {
  func.func @kernel(%arg0: i32, %arg1: memref<1x2x128xf32, #tpu.memory_space<vmem>>, %arg2: memref<16x32xbf16, #tpu.memory_space<vmem>>, %arg3: memref<16x128xf32, #tpu.memory_space<vmem>>, %arg4: memref<16x32xf32, #tpu.memory_space<vmem>>, %arg5: memref<1x4x32xf32, #tpu.memory_space<vmem>>, %arg6: memref<1x2x128xf32, #tpu.memory_space<vmem>>, %arg7: memref<3x128xf32, #tpu.memory_space<vmem>>) attributes {dimension_semantics = [#tpu.dimension_semantics<parallel>], iteration_bounds = array<i64: 4>, scalar_prefetch = 0 : i64, scratch_operands = 1 : i64, tpu.core_type = #tpu.core_type<tc>, window_params = [{transform_indices = @transform_0, window_bounds = array<i64: 1, 2, 128>}, {pipeline_mode = #tpu.pipeline_mode<synchronous>, transform_indices = @transform_1, window_bounds = array<i64: 16, 32>}, {pipeline_mode = #tpu.pipeline_mode<synchronous>, transform_indices = @transform_2, window_bounds = array<i64: 16, 128>}, {pipeline_mode = #tpu.pipeline_mode<synchronous>, transform_indices = @transform_3, window_bounds = array<i64: 16, 32>}, {transform_indices = @transform_4, window_bounds = array<i64: 1, 4, 32>}, {transform_indices = @transform_5, window_bounds = array<i64: 1, 2, 128>}]} {
    %c0 = arith.constant 0 : index
    %c0_0 = arith.constant 0 : index
    %c0_1 = arith.constant 0 : index
    %0 = vector.load %arg1[%c0, %c0_0, %c0_1] : memref<1x2x128xf32, #tpu.memory_space<vmem>>, vector<1x2x128xf32>
    %1 = vector.shape_cast %0 : vector<1x2x128xf32> to vector<2x128xf32>
    %c0_2 = arith.constant 0 : index
    %c0_3 = arith.constant 0 : index
    %2 = vector.load %arg7[%c0_2, %c0_3] : memref<3x128xf32, #tpu.memory_space<vmem>>, vector<2x128xf32>
    tpu.vector_store %arg7[%c0_2, %c0_3], %1 {strides = array<i32>} : memref<3x128xf32, #tpu.memory_space<vmem>>, vector<2x128xf32>,
    %cst = arith.constant 0.000000e+00 : f32
    %3 = vector.broadcast %cst : f32 to vector<1x128xf32>
    %c2 = arith.constant 2 : index
    %c0_4 = arith.constant 0 : index
    %4 = vector.load %arg7[%c2, %c0_4] : memref<3x128xf32, #tpu.memory_space<vmem>>, vector<1x128xf32>
    tpu.vector_store %arg7[%c2, %c0_4], %3 {strides = array<i32>} : memref<3x128xf32, #tpu.memory_space<vmem>>, vector<1x128xf32>,
    %5 = tpu.iota {dimensions = array<i32: 0>} : vector<16x128xi32>
    %c128_i32 = arith.constant 128 : i32
    %6 = vector.broadcast %c128_i32 : i32 to vector<16x128xi32>
    %7 = arith.muli %5, %6 : vector<16x128xi32>
    %8 = tpu.iota {dimensions = array<i32: 1>} : vector<16x128xi32>
    %9 = arith.addi %7, %8 : vector<16x128xi32>
    %c0_i32 = arith.constant 0 : i32
    %c4_i32 = arith.constant 4 : i32
    %10 = arith.addi %c0_i32, %c4_i32 : i32
    %c1_i32 = arith.constant 1 : i32
    scf.for %arg8 = %c0_i32 to %10 step %c1_i32  : i32 {
      %cst_11 = arith.constant 0xFF800000 : f32
      %15 = vector.broadcast %cst_11 : f32 to vector<1x1xf32>
      %c0_i32_12 = arith.constant 0 : i32
      %16 = vector.broadcast %c0_i32_12 : i32 to vector<1x1xi32>
      %c0_i32_13 = arith.constant 0 : i32
      %17 = vector.broadcast %c0_i32_13 : i32 to vector<1x1xi32>
      %c0_i32_14 = arith.constant 0 : i32
      %c2_i32 = arith.constant 2 : i32
      %18 = arith.addi %c0_i32_14, %c2_i32 : i32
      %c1_i32_15 = arith.constant 1 : i32
      %19:3 = scf.for %arg9 = %c0_i32_14 to %18 step %c1_i32_15 iter_args(%arg10 = %15, %arg11 = %16, %arg12 = %17) -> (vector<1x1xf32>, vector<1x1xi32>, vector<1x1xi32>)  : i32 {
        %77 = arith.index_cast %arg9 : i32 to index
        %c0_46 = arith.constant 0 : index
        %78 = vector.load %arg7[%77, %c0_46] : memref<3x128xf32, #tpu.memory_space<vmem>>, vector<1x128xf32>
        %c1_i32_47 = arith.constant 1 : i32
        %79 = arith.addi %arg9, %c1_i32_47 : i32
        %80 = arith.index_cast %79 : i32 to index
        %c0_48 = arith.constant 0 : index
        %81 = vector.load %arg7[%80, %c0_48] : memref<3x128xf32, #tpu.memory_space<vmem>>, vector<1x128xf32>
        %82 = tpu.concatenate %78, %81 in 1 : vector<1x128xf32>, vector<1x128xf32> -> vector<1x256xf32>
        %c255_i32 = arith.constant 255 : i32
        %83 = tpu.dynamic_rotate %82 by %c255_i32 dim 1 : vector<1x256xf32>, i32 -> vector<1x256xf32>
        %c254_i32 = arith.constant 254 : i32
        %84 = tpu.dynamic_rotate %82 by %c254_i32 dim 1 : vector<1x256xf32>, i32 -> vector<1x256xf32>
        %c253_i32 = arith.constant 253 : i32
        %85 = tpu.dynamic_rotate %82 by %c253_i32 dim 1 : vector<1x256xf32>, i32 -> vector<1x256xf32>
        %c252_i32 = arith.constant 252 : i32
        %86 = tpu.dynamic_rotate %82 by %c252_i32 dim 1 : vector<1x256xf32>, i32 -> vector<1x256xf32>
        %c251_i32 = arith.constant 251 : i32
        %87 = tpu.dynamic_rotate %82 by %c251_i32 dim 1 : vector<1x256xf32>, i32 -> vector<1x256xf32>
        %c250_i32 = arith.constant 250 : i32
        %88 = tpu.dynamic_rotate %82 by %c250_i32 dim 1 : vector<1x256xf32>, i32 -> vector<1x256xf32>
        %c249_i32 = arith.constant 249 : i32
        %89 = tpu.dynamic_rotate %82 by %c249_i32 dim 1 : vector<1x256xf32>, i32 -> vector<1x256xf32>
        %90 = tpu.concatenate %82, %83, %84, %85, %86, %87, %88, %89 in 0 : vector<1x256xf32>, vector<1x256xf32>, vector<1x256xf32>, vector<1x256xf32>, vector<1x256xf32>, vector<1x256xf32>, vector<1x256xf32>, vector<1x256xf32> -> vector<8x256xf32>
        %91 = vector.extract_strided_slice %90 {offsets = [0, 0], sizes = [8, 128], strides = [1, 1]} : vector<8x256xf32> to vector<8x128xf32>
        %92 = vector.extract_strided_slice %90 {offsets = [0, 8], sizes = [8, 128], strides = [1, 1]} : vector<8x256xf32> to vector<8x128xf32>
        %93 = vector.extract_strided_slice %90 {offsets = [0, 16], sizes = [8, 128], strides = [1, 1]} : vector<8x256xf32> to vector<8x128xf32>
        %94 = vector.extract_strided_slice %90 {offsets = [0, 24], sizes = [8, 128], strides = [1, 1]} : vector<8x256xf32> to vector<8x128xf32>
        %95 = tpu.concatenate %91, %92, %93, %94 in 0 : vector<8x128xf32>, vector<8x128xf32>, vector<8x128xf32>, vector<8x128xf32> -> vector<32x128xf32>
        %c0_49 = arith.constant 0 : index
        %c0_50 = arith.constant 0 : index
        %96 = vector.load %arg2[%c0_49, %c0_50] : memref<16x32xbf16, #tpu.memory_space<vmem>>, vector<16x32xbf16>
        %97 = arith.truncf %95 : vector<32x128xf32> to vector<32x128xbf16>
        %cst_51 = arith.constant dense<0.000000e+00> : vector<16x128xf32>
        %98 = tpu.matmul %96, %97, %cst_51 {dimension_numbers = #tpu.dot_dimension_numbers<[1], [0], [0], [1], [0, 0, 1, 1], [], []>} : vector<16x32xbf16>, vector<32x128xbf16>, vector<16x128xf32> -> vector<16x128xf32>
        %99 = vector.shape_cast %98 : vector<16x128xf32> to vector<1x16x128xf32>
        %cst_52 = arith.constant dense<0xFF800000> : vector<1xf32>
        %100 = vector.multi_reduction <maximumf>, %99, %cst_52 [1, 2] : vector<1x16x128xf32> to vector<1xf32>
        %101 = vector.shape_cast %100 : vector<1xf32> to vector<1x1x1xf32>
        %102 = vector.extract %101[0, 0, 0] : f32 from vector<1x1x1xf32>
        %103 = vector.broadcast %102 : f32 to vector<1x1xf32>
        %104 = vector.broadcast %103 : vector<1x1xf32> to vector<16x128xf32>
        %105 = arith.cmpf oeq, %98, %104 : vector<16x128xf32>
        %c2048_i32 = arith.constant 2048 : i32
        %106 = vector.broadcast %c2048_i32 : i32 to vector<16x128xi32>
        %107 = arith.select %105, %9, %106 : vector<16x128xi1>, vector<16x128xi32>
        %108 = vector.shape_cast %107 : vector<16x128xi32> to vector<1x16x128xi32>
        %cst_53 = arith.constant dense<2147483647> : vector<1xi32>
        %109 = vector.multi_reduction <minsi>, %108, %cst_53 [1, 2] : vector<1x16x128xi32> to vector<1xi32>
        %110 = vector.shape_cast %109 : vector<1xi32> to vector<1x1x1xi32>
        %111 = vector.extract %110[0, 0, 0] : i32 from vector<1x1x1xi32>
        %112 = vector.broadcast %111 : i32 to vector<1x1xi32>
        %c7_i32_54 = arith.constant 7 : i32
        %113 = vector.broadcast %c7_i32_54 : i32 to vector<1x1xi32>
        %114 = arith.shrsi %112, %113 : vector<1x1xi32>
        %c127_i32_55 = arith.constant 127 : i32
        %115 = vector.broadcast %c127_i32_55 : i32 to vector<1x1xi32>
        %116 = arith.andi %112, %115 : vector<1x1xi32>
        %c128_i32_56 = arith.constant 128 : i32
        %117 = arith.muli %arg9, %c128_i32_56 : i32
        %118 = vector.broadcast %117 : i32 to vector<1x1xi32>
        %119 = arith.addi %116, %118 : vector<1x1xi32>
        %120 = arith.cmpf ogt, %103, %arg10 : vector<1x1xf32>
        %121 = arith.cmpf oeq, %103, %arg10 : vector<1x1xf32>
        %122 = arith.cmpi slt, %114, %arg11 : vector<1x1xi32>
        %123 = arith.cmpi eq, %114, %arg11 : vector<1x1xi32>
        %124 = arith.cmpi slt, %119, %arg12 : vector<1x1xi32>
        %125 = arith.andi %123, %124 : vector<1x1xi1>
        %126 = arith.ori %122, %125 : vector<1x1xi1>
        %127 = arith.andi %121, %126 : vector<1x1xi1>
        %128 = arith.ori %120, %127 : vector<1x1xi1>
        %129 = arith.select %128, %103, %arg10 : vector<1x1xi1>, vector<1x1xf32>
        %130 = arith.select %128, %114, %arg11 : vector<1x1xi1>, vector<1x1xi32>
        %131 = arith.select %128, %119, %arg12 : vector<1x1xi1>, vector<1x1xi32>
        scf.yield %129, %130, %131 : vector<1x1xf32>, vector<1x1xi32>, vector<1x1xi32>
      }
      %c2_i32_16 = arith.constant 2 : i32
      %20 = vector.extract %19#0[0, 0] : f32 from vector<1x1xf32>
      %21 = vector.extract %19#1[0, 0] : i32 from vector<1x1xi32>
      %22 = vector.extract %19#2[0, 0] : i32 from vector<1x1xi32>
      %23 = arith.index_cast %21 : i32 to index
      %c0_17 = arith.constant 0 : index
      %24 = vector.load %arg3[%23, %c0_17] : memref<16x128xf32, #tpu.memory_space<vmem>>, vector<1x128xf32>
      %25 = vector.broadcast %20 : f32 to vector<1x128xf32>
      %26 = arith.mulf %24, %25 : vector<1x128xf32>
      %cst_18 = arith.constant 0.000000e+00 : f32
      %27 = vector.broadcast %cst_18 : f32 to vector<1x128xf32>
      %28 = tpu.concatenate %26, %27 in 1 : vector<1x128xf32>, vector<1x128xf32> -> vector<1x256xf32>
      %c7_i32 = arith.constant 7 : i32
      %29 = arith.shrsi %22, %c7_i32 : i32
      %c127_i32 = arith.constant 127 : i32
      %30 = arith.andi %22, %c127_i32 : i32
      %31 = tpu.dynamic_rotate %28 by %30 dim 1 : vector<1x256xf32>, i32 -> vector<1x256xf32>
      %32 = arith.index_cast %29 : i32 to index
      %c0_19 = arith.constant 0 : index
      %33 = vector.load %arg7[%32, %c0_19] : memref<3x128xf32, #tpu.memory_space<vmem>>, vector<1x128xf32>
      %34 = vector.extract_strided_slice %31 {offsets = [0, 0], sizes = [1, 128], strides = [1, 1]} : vector<1x256xf32> to vector<1x128xf32>
      %35 = arith.subf %33, %34 : vector<1x128xf32>
      %36 = arith.index_cast %29 : i32 to index
      %c0_20 = arith.constant 0 : index
      %37 = vector.load %arg7[%36, %c0_20] : memref<3x128xf32, #tpu.memory_space<vmem>>, vector<1x128xf32>
      tpu.vector_store %arg7[%36, %c0_20], %35 {strides = array<i32>} : memref<3x128xf32, #tpu.memory_space<vmem>>, vector<1x128xf32>,
      %c1_i32_21 = arith.constant 1 : i32
      %38 = arith.addi %29, %c1_i32_21 : i32
      %39 = arith.index_cast %38 : i32 to index
      %c0_22 = arith.constant 0 : index
      %40 = vector.load %arg7[%39, %c0_22] : memref<3x128xf32, #tpu.memory_space<vmem>>, vector<1x128xf32>
      %41 = vector.extract_strided_slice %31 {offsets = [0, 128], sizes = [1, 128], strides = [1, 1]} : vector<1x256xf32> to vector<1x128xf32>
      %42 = arith.subf %40, %41 : vector<1x128xf32>
      %c1_i32_23 = arith.constant 1 : i32
      %43 = arith.addi %29, %c1_i32_23 : i32
      %44 = arith.index_cast %43 : i32 to index
      %c0_24 = arith.constant 0 : index
      %45 = vector.load %arg7[%44, %c0_24] : memref<3x128xf32, #tpu.memory_space<vmem>>, vector<1x128xf32>
      tpu.vector_store %arg7[%44, %c0_24], %42 {strides = array<i32>} : memref<3x128xf32, #tpu.memory_space<vmem>>, vector<1x128xf32>,
      %cst_25 = arith.constant 0.000000e+00 : f32
      %46 = vector.broadcast %cst_25 : f32 to vector<1x128xf32>
      %c2_26 = arith.constant 2 : index
      %c0_27 = arith.constant 0 : index
      %47 = vector.load %arg7[%c2_26, %c0_27] : memref<3x128xf32, #tpu.memory_space<vmem>>, vector<1x128xf32>
      tpu.vector_store %arg7[%c2_26, %c0_27], %46 {strides = array<i32>} : memref<3x128xf32, #tpu.memory_space<vmem>>, vector<1x128xf32>,
      %c0_i32_28 = arith.constant 0 : i32
      %48 = arith.cmpi eq, %22, %c0_i32_28 : i32
      %c1_i32_29 = arith.constant 1 : i32
      %c0_i32_30 = arith.constant 0 : i32
      %49 = arith.select %48, %c1_i32_29, %c0_i32_30 : i32
      %cst_31 = arith.constant 0.000000e+00 : f32
      %50 = arith.cmpf ogt, %20, %cst_31 : f32
      %cst_32 = arith.constant 0.000000e+00 : f32
      %51 = arith.cmpf olt, %20, %cst_32 : f32
      %c0_i32_33 = arith.constant 0 : i32
      %52 = arith.select %51, %49, %c0_i32_33 : i32
      %53 = arith.select %50, %22, %52 : i32
      %c0_i32_34 = arith.constant 0 : i32
      %54 = arith.cmpi eq, %21, %c0_i32_34 : i32
      %c1_i32_35 = arith.constant 1 : i32
      %c0_i32_36 = arith.constant 0 : i32
      %55 = arith.select %54, %c1_i32_35, %c0_i32_36 : i32
      %cst_37 = arith.constant 0.000000e+00 : f32
      %56 = arith.cmpf ogt, %20, %cst_37 : f32
      %cst_38 = arith.constant 0.000000e+00 : f32
      %57 = arith.cmpf olt, %20, %cst_38 : f32
      %c0_i32_39 = arith.constant 0 : i32
      %58 = arith.select %57, %55, %c0_i32_39 : i32
      %59 = arith.select %56, %21, %58 : i32
      %60 = arith.sitofp %53 : i32 to f32
      %cst_40 = arith.constant 0.0784313753 : f32
      %61 = arith.mulf %60, %cst_40 : f32
      %62 = arith.index_cast %59 : i32 to index
      %c0_41 = arith.constant 0 : index
      %63 = vector.load %arg4[%62, %c0_41] : memref<16x32xf32, #tpu.memory_space<vmem>>, vector<1x32xf32>
      %64 = tpu.iota {dimensions = array<i32: 1>} : vector<1x32xi32>
      %c0_i32_42 = arith.constant 0 : i32
      %65 = vector.broadcast %c0_i32_42 : i32 to vector<1x32xi32>
      %66 = arith.cmpi eq, %64, %65 : vector<1x32xi32>
      %c1_i32_43 = arith.constant 1 : i32
      %67 = vector.broadcast %c1_i32_43 : i32 to vector<1x32xi32>
      %68 = arith.cmpi eq, %64, %67 : vector<1x32xi32>
      %69 = vector.broadcast %20 : f32 to vector<1x32xf32>
      %70 = arith.select %68, %69, %63 : vector<1x32xi1>, vector<1x32xf32>
      %71 = vector.broadcast %61 : f32 to vector<1x32xf32>
      %72 = arith.select %66, %71, %70 : vector<1x32xi1>, vector<1x32xf32>
      %c0_44 = arith.constant 0 : index
      %73 = arith.index_cast %arg8 : i32 to index
      %c0_45 = arith.constant 0 : index
      %74 = vector.load %arg5[%c0_44, %73, %c0_45] : memref<1x4x32xf32, #tpu.memory_space<vmem>>, vector<1x1x32xf32>
      %75 = vector.shape_cast %74 : vector<1x1x32xf32> to vector<1x32xf32>
      %76 = vector.shape_cast %72 : vector<1x32xf32> to vector<1x1x32xf32>
      tpu.vector_store %arg5[%c0_44, %73, %c0_45], %76 {strides = array<i32>} : memref<1x4x32xf32, #tpu.memory_space<vmem>>, vector<1x1x32xf32>,
    }
    %c4_i32_5 = arith.constant 4 : i32
    %c0_6 = arith.constant 0 : index
    %c0_7 = arith.constant 0 : index
    %11 = vector.load %arg7[%c0_6, %c0_7] : memref<3x128xf32, #tpu.memory_space<vmem>>, vector<2x128xf32>
    %c0_8 = arith.constant 0 : index
    %c0_9 = arith.constant 0 : index
    %c0_10 = arith.constant 0 : index
    %12 = vector.load %arg6[%c0_8, %c0_9, %c0_10] : memref<1x2x128xf32, #tpu.memory_space<vmem>>, vector<1x2x128xf32>
    %13 = vector.shape_cast %12 : vector<1x2x128xf32> to vector<2x128xf32>
    %14 = vector.shape_cast %11 : vector<2x128xf32> to vector<1x2x128xf32>
    tpu.vector_store %arg6[%c0_8, %c0_9, %c0_10], %14 {strides = array<i32>} : memref<1x2x128xf32, #tpu.memory_space<vmem>>, vector<1x2x128xf32>,
    return
  }
  func.func @transform_0(%arg0: i32) -> (i32, i32, i32) {
    %c0_i32 = arith.constant 0 : i32
    %c0_i32_0 = arith.constant 0 : i32
    %c0_i32_1 = arith.constant 0 : i32
    return %arg0, %c0_i32, %c0_i32_0 : i32, i32, i32
  }
  func.func @transform_1(%arg0: i32) -> (i32, i32) {
    %c0_i32 = arith.constant 0 : i32
    %c0_i32_0 = arith.constant 0 : i32
    %c0_i32_1 = arith.constant 0 : i32
    return %c0_i32, %c0_i32_0 : i32, i32
  }
  func.func @transform_2(%arg0: i32) -> (i32, i32) {
    %c0_i32 = arith.constant 0 : i32
    %c0_i32_0 = arith.constant 0 : i32
    %c0_i32_1 = arith.constant 0 : i32
    return %c0_i32, %c0_i32_0 : i32, i32
  }
  func.func @transform_3(%arg0: i32) -> (i32, i32) {
    %c0_i32 = arith.constant 0 : i32
    %c0_i32_0 = arith.constant 0 : i32
    %c0_i32_1 = arith.constant 0 : i32
    return %c0_i32, %c0_i32_0 : i32, i32
  }
  func.func @transform_4(%arg0: i32) -> (i32, i32, i32) {
    %c0_i32 = arith.constant 0 : i32
    %c0_i32_0 = arith.constant 0 : i32
    %c0_i32_1 = arith.constant 0 : i32
    return %arg0, %c0_i32, %c0_i32_0 : i32, i32, i32
  }
  func.func @transform_5(%arg0: i32) -> (i32, i32, i32) {
    %c0_i32 = arith.constant 0 : i32
    %c0_i32_0 = arith.constant 0 : i32
    %c0_i32_1 = arith.constant 0 : i32
    return %arg0, %c0_i32, %c0_i32_0 : i32, i32, i32
  }
}

</mosaic_0001>

<bundles_post_ra>
// kernel: sparse_coding_loss.3
= control target key start
LH: loop header
LB: loop body
LE: loop exit
PB: predicated region body
PF: predicated region fallthrough
CT: control target
= control target key end

     0   :  { %v39_v1 = vlaneseq  ;;  %v139_v2 = vmov 1983009808   ;;  %s188_s0 = inlined_call_operand.vmem [shape: f32[2,128], index: 0, kind: input, shape index: {}]   ;;  %s189_s1 = inlined_call_operand.vmem [shape: f32[2,128], index: 1, kind: input, shape index: {}]   ;;  %s190_s2 = inlined_call_operand.vmem [shape: f32[2,256], index: 2, kind: input, shape index: {}]   ;;  %s191_s3 = inlined_call_operand.vmem [shape: f32[2,256], index: 3, kind: input, shape index: {}]   ;;  %s192_s4 = inlined_call_operand.hbm [shape: f32[1,1], index: 4, kind: output, shape index: {}]  }
   0x1   :  { %v33_v0 = vld [vmem:[%s190_s2] sm:$0xf]  ;;  %v37_v3 = vunpack.c.l.s4 %v139_v2 }
   0x2   :  { %v58_v4 = vld [vmem:[%s191_s3] sm:$0xf]  ;;  %v40_v7 = vshrl.u32 %v39_v1, 7 }
   0x3   :  { %v18_v5 = vld [vmem:[%s188_s0] sm:$0x3] }
   0x4   :  { %v19_v6 = vld [vmem:[%s189_s1] sm:$0x3] }
   0x5   :  { %v20_v8 = vsub.f32 %v18_v5, %v19_v6 }
   0x6   :  { %9 = vsyncpa [#allocation3], 0  ;;  %v34_v9 = vmul.f32 %v33_v0, %v33_v0  ;;  %v38_v10 = vunpack.c.0.s8 %v37_v3  ;;  %v59_v11 = vmul.f32 %v58_v4, %v58_v4  ;;  %vm22_vm0 = vcmask 1041408   ;;  %s140_s0 = smov [#allocation2]  }
   0x7   :  { %v21_v12 = vmul.f32 %v20_v8, %v20_v8  ;;  %s103_s1 = sshll.u32 %s140_s0, 4  ;;  %vm95_vm5 = vcmask 0   ;;  %s104_s1 = int_to_ptr.vmem [resolvable:$true] %s103_s1 }
   0x8   :  { %v41_v13 = vsub.s32 %v38_v10, %v40_v7  ;;  %s117_s2 = scalar_lea.vmem %s104_s1, 16  ;;  %s121_s3 = scalar_lea.vmem %s104_s1, 32 }
   0x9   :  { %v23_v14 = vsel %vm22_vm0, %v21_v12, 0.0  ;;  %p118_p0 = scmp.ne.s32.totalorder %s104_s1, %s117_s2  ;;  %p122_p1 = scmp.lt.s32.totalorder %s104_s1, %s104_s1 }
   0xa   :  { %v42_v15 = vrot.slane %v34_v9, %v41_v13  ;;  %v67_v16 = vrot.slane %v59_v11, %v41_v13  ;;  %24 = vadd.xlane.f32.xlu1 %v23_v14  ;;  %p123_p2 = scmp.lt.s32.totalorder %s121_s3, %s117_s2 }
   0xc   :  { %v43_v17 = vcombine.high %v42_v15, %v42_v15  ;;  %v46_v18 = vsel %vm22_vm0, %v42_v15, 0.0  ;;  %v68_v19 = vcombine.high %v67_v16, %v67_v16  ;;  %v71_v21 = vsel %vm22_vm0, %v67_v16, 0.0  ;;  %p124_p3 = por %p123_p2, %p122_p1 }
   0xe   :  { %v47_v20 = vsel %vm22_vm0, %v43_v17, 0.0  ;;  %v72_v22 = vsel %vm22_vm0, %v68_v19, 0.0  ;;  %p125_p4 = pnand %p124_p3, %p118_p0 }
   0xf   :  { %v48_v23 = vadd.f32 %v47_v20, %v46_v18  ;;  %v73_v24 = vadd.f32 %v72_v22, %v71_v21 }
  0x11   :  { %49 = vadd.xlane.f32.xlu0 %v48_v23 }
  0x15   :  { %74 = vadd.xlane.f32.xlu0 %v73_v24 }
  0x93   :  { %v25_v27 = vpop.xlane.xlu1 %24 }
  0x94   :  { %v26_v28 = vsel %vm22_vm0, %v25_v27, 0.0 }
  0x95   :  { %v27_v31 = vrot.slane %v26_v28, 4 }
  0x97   :  { %v28_v37 = vadd.f32 %v27_v31, %v26_v28 }
  0x99   :  { %v29_v42 = vrot.slane %v28_v37, 2 }
  0x9a   :  { %v50_v25 = vpop.xlane.xlu0 %49 }
  0x9b   :  { %113 = vrsqrt.f32 %v50_v25  ;;  %vm53_vm1 = vcmp.eq.f32.partialorder %v50_v25, inf  ;;  %v56_v35 = vand.u32 2147483648, %v50_v25  ;;  %vm55_vm3 = vcmp.eq.f32.partialorder %v50_v25, 0.0 }
  0x9c   :  { %v30_v45 = vadd.f32 %v29_v42, %v28_v37 }
  0x9e   :  { %v75_v26 = vpop.xlane.xlu0 %74  ;;  %v31_v48 = vrot.slane %v30_v45, 1 }
  0x9f   :  { %115 = vrsqrt.f32 %v75_v26  ;;  %vm78_vm2 = vcmp.eq.f32.partialorder %v75_v26, inf  ;;  %v81_v36 = vand.u32 2147483648, %v75_v26  ;;  %vm80_vm4 = vcmp.eq.f32.partialorder %v75_v26, 0.0 }
  0xa0   :  { %v32_v51 = vadd.f32 %v31_v48, %v30_v45 }
  0xa2   :  { %v92_v54 = vmul.f32 0.00390625, %v32_v51 }
  0xa8   :  { %v114_v29 = vpop.eup %113 }
  0xa9   :  { %v52_v30 = vmul.f32 %v114_v29, %v50_v25 }
  0xab   :  { %v54_v33 = vsel %vm53_vm1, %v50_v25, %v52_v30 }
  0xac   :  { %v116_v32 = vpop.eup %115  ;;  %v57_v39 = vsel %vm55_vm3, %v56_v35, %v54_v33 }
  0xad   :  { %v77_v34 = vmul.f32 %v116_v32, %v75_v26 }
  0xaf   :  { %v79_v38 = vsel %vm78_vm2, %v75_v26, %v77_v34 }
  0xb0   :  { %v82_v40 = vsel %vm80_vm4, %v81_v36, %v79_v38 }
  0xb1   :  { %v83_v41 = vsub.f32 %v57_v39, %v82_v40 }
  0xb3   :  { %v84_v43 = vand.u32 2147483647, %v83_v41 }
  0xb5   :  { %v85_v44 = vsel %vm22_vm0, %v84_v43, 0.0 }
  0xb6   :  { %v86_v46 = vrot.slane %v85_v44, 4 }
  0xb8   :  { %v87_v47 = vadd.f32 %v86_v46, %v85_v44 }
  0xba   :  { %v88_v49 = vrot.slane %v87_v47, 2 }
  0xbc   :  { %v89_v50 = vadd.f32 %v88_v49, %v87_v47 }
  0xbe   :  { %v90_v52 = vrot.slane %v89_v50, 1 }
  0xc0   :  { %v91_v53 = vadd.f32 %v90_v52, %v89_v50 }
  0xc2   :  { %v93_v55 = vmul.f32 0.5, %v91_v53 }
  0xc4   :  { %v94_v56 = vadd.f32 %v93_v55, %v92_v54 }
  0xc6   :  { %96 = vst.msk [vmem:[#allocation2] sm:$0x1] %vm95_vm5, %v94_v56 }
  0xc7   :  { %128 = shalt.err (!%p125_p4)
}
  0xc8   :  { %106 = dma.vmem_to_hbm [thread:$0]  %s104_s1, 16, %s192_s4, [#allocation3]  }
  0xc9   :  { %137 = dma.done.wait [#allocation3], 16  }
  0xca   :  { %138 = vsyncadd [#allocation3], 4294967280 }
  0xcb   :  { %110 = vsyncpa [#allocation3], 1 }

// kernel: sparse_coding_loss.2
= control target key start
LH: loop header
LB: loop body
LE: loop exit
PB: predicated region body
PF: predicated region fallthrough
CT: control target
= control target key end

     0   :  { %s925_s18 = smov 0   ;;  %s1075_s0 = inlined_call_operand.vmem [shape: f32[4,2,128], index: 0, kind: input, shape index: {}]   ;;  %s1076_s1 = inlined_call_operand.vmem [shape: bf16[16,32], index: 1, kind: input, shape index: {}]   ;;  %s1077_s2 = inlined_call_operand.vmem [shape: f32[16,128], index: 2, kind: input, shape index: {}]   ;;  %s1078_s3 = inlined_call_operand.vmem [shape: f32[16,32], index: 3, kind: input, shape index: {}]   ;;  %s1079_s4 = inlined_call_operand.vmem [shape: f32[4,4,32], index: 4, kind: output, shape index: {0}]   ;;  %s1080_s5 = inlined_call_operand.vmem [shape: f32[4,2,128], index: 5, kind: output, shape index: {1}]  }
   0x1 LB: > { %s683_s19 = sadd.s32 4294967295, %s859_s18   ;;  %p687_p0 = scmp.ge.s32.totalorder %s859_s18, 1  ;;  %s859_s18 = sphi %s925_s18, %s16_s18  }
   0x2   : > { %p189_p1 = scmp.lt.s32.totalorder %s859_s18, 5 }
   0x4   : > { %p190_p2 = pnand %p687_p0, %p189_p1 }
   0x5   : > { %p219_p3 = scmp.lt.s32.totalorder (!%p190_p2), %s683_s19, 3  ;;  %s954_s6 = smov (!%p190_p2), 0  }
   0x6   : > { %193 = sbr.rel (%p190_p2) target bundleno = 1240 (0x4d8), region = 36 }
   0xb   : > { %v235_v0 = vlaneseq  ;;  %v881_v1 = vmov 0.0   ;;  %s1085_s19 = smov (!%p219_p3, %s683_s19), 3 }
   0xc   : > { %234 = vst [vmem:[#allocation2 + $0x2] sm:$0x1] %v881_v1  ;;  %s688_s20 = sshll.u32 %s1085_s19, 1  ;;  %s689_s21 = sshll.u32 %s1085_s19, 2 }
   0xd   : > { %v236_v2 = vshrl.u32 %v235_v0, 7  ;;  %v933_v3 = vand.u32 127, %v235_v0  ;;  %s222_s24 = scalar_lea.vmem %s1075_s0, %s688_s20  ;;  %s941_s27 = scalar_lea.vmem %s1079_s4, %s689_s21 }
   0xe   : > { %s946_s30 = scalar_lea.vmem %s1080_s5, %s688_s20  ;;  %v232_v6 = vld [vmem:[%s222_s24] sm:$0x3] }
   0xf   : > { %v237_v4 = vadd.s32 8, %v236_v2  ;;  %v238_v5 = vmul.u32 128, %v236_v2  ;;  %233 = vst [vmem:[#allocation2] sm:$0x3] %v232_v6 }
  0x11   : > { %v239_v7 = vmul.u32 128, %v237_v4  ;;  %v949_v8 = vadd.s32 %v933_v3, %v238_v5 }
  0x13   : > { %v952_v9 = vadd.s32 %v933_v3, %v239_v7 }
  0x14 LB: >> { %v959_v10 = vmov 0   ;;  %v961_v11 = vmov 0   ;;  %v963_v12 = vmov -inf   ;;  %s965_s7 = smov 0   ;;  %s863_s6 = sphi %s954_s6, %s249_s6  }
  0x15 LB: >>> { %s259_s8 = scalar_lea.vmem [#allocation2], %s879_s7  ;;  %s882_s9 = smov 127   ;;  %vm268_vm0 = vcmp.lt.s32.totalorder %v933_v3, 127  ;;  %vm355_vm1 = vcmask 1040384   ;;  %vm282_vm2 = vcmp.lt.s32.totalorder %v933_v3, 125  ;;  %vm275_vm3 = vcmp.lt.s32.totalorder %v933_v3, 126  ;;  %s879_s7 = sphi %s965_s7, %s255_s7   ;;  %v875_v12 = vphi %v963_v12, %v1083_v12   ;;  %v871_v11 = vphi %v961_v11, %v1082_v11   ;;  %v867_v10 = vphi %v959_v10, %v1081_v10  }
  0x16   : >>> { %v260_v13 = vld [vmem:[%s259_s8] sm:$0x1]  ;;  %v691_v14 = vld [vmem:[%s259_s8 + $0x1] sm:$0x1]  ;;  %s883_s10 = smov 125   ;;  %s884_s11 = smov 126  }
  0x17   : >>> { %v782_v15 = vpack.i.bf16 %v691_v14, %v260_v13  ;;  %s885_s12 = smov 124   ;;  %s886_s13 = smov 123   ;;  %vm358_vm4 = vcmask 1041408   ;;  %vm289_vm5 = vcmp.lt.s32.totalorder %v933_v3, 124  ;;  %vm361_vm6 = vcmask 1042432  }
  0x18   : >>> { %s887_s14 = smov 122   ;;  %s888_s15 = smov 121   ;;  %vm364_vm7 = vcmask 1043456   ;;  %vm296_vm8 = vcmp.lt.s32.totalorder %v933_v3, 123  ;;  %vm367_vm9 = vcmask 1044480   ;;  %vm303_vm10 = vcmp.lt.s32.totalorder %v933_v3, 122 }
  0x19   : >>> { %783 = vrot.lane.b32.xlu0 %v782_v15, %s882_s9  ;;  %793 = vrot.lane.b32.xlu1 %v782_v15, %s883_s10  ;;  %vm310_vm11 = vcmp.lt.s32.totalorder %v933_v3, 121  ;;  %vm370_vm12 = vcmask 1045504   ;;  %vm373_vm13 = vcmask 1046528   ;;  %vm890_vm14 = vmmov 0   ;;  %s891_s16 = smov 104   ;;  %s892_s17 = smov 112  }
  0x1a   : >>> { %s893_s19 = smov 120   ;;  %vm389_vm15 = vcmask 916480   ;;  %s694_s23 = sshll.u32 %s879_s7, 7 }
  0x1b   : >>> { %s255_s7 = sadd.s32 1, %s879_s7  }
  0x1c   : >>> { %p252_p4 = scmp.ge.s32.totalorder %s255_s7, 2  }
  0x1d   : >>> { %788 = vrot.lane.b32.xlu0 %v782_v15, %s884_s11  ;;  %798 = vrot.lane.b32.xlu1 %v782_v15, %s885_s12  ;;  %s566_s21 = scalar_lea.vmem (%p252_p4), %s941_s27, %s863_s6  ;;  %s249_s6 = sadd.s32 (%p252_p4), 1, %s863_s6  }
  0x1e   : >> { %p246_p9 = scmp.ge.s32.totalorder (%p252_p4), %s249_s6, 4  }
  0x21   : >>> { %803 = vrot.lane.b32.xlu0 %v782_v15, %s886_s13  ;;  %808 = vrot.lane.b32.xlu1 %v782_v15, %s887_s14 }
  0x25   : >>> { %813 = vrot.lane.b32.xlu0 %v782_v15, %s888_s15 }
  0x8b   : >>> { %v784_v16 = vpop.permute.xlu0 %783  ;;  %v794_v17 = vpop.permute.xlu1 %793 }
  0x8c   : >>> { %v786_v18 = vunpack.i.h.bf16 %v784_v16  ;;  %v785_v19 = vunpack.i.l.bf16 %v784_v16  ;;  %v796_v20 = vunpack.i.h.bf16 %v794_v17  ;;  %v795_v21 = vunpack.i.l.bf16 %v794_v17 }
  0x8d   : >>> { %v889_v17 = vmov 0.0  }
  0x8e   : >>> { %v269_v22 = vsel %vm268_vm0, %v785_v19, %v786_v18  ;;  %v270_v23 = vsel %vm268_vm0, %v786_v18, %v785_v19  ;;  %v283_v24 = vsel %vm282_vm2, %v795_v21, %v796_v20  ;;  %v284_v25 = vsel %vm282_vm2, %v796_v20, %v795_v21  ;;  %702 = vmatprep.subr.bf16.mxu0 %v889_v17 }
  0x8f   : >>> { %v315_v26 = vrot.slane %v269_v22, 7  ;;  %v316_v27 = vrot.slane %v270_v23, 7  ;;  %v789_v28 = vpop.permute.xlu0 %788  ;;  %v799_v29 = vpop.permute.xlu1 %798  ;;  %v327_v36 = vrot.slane %v283_v24, 5  ;;  %v328_v37 = vrot.slane %v284_v25, 5  ;;  %706 = vmatprep.mubr.msk.bf16.mxu0 %vm890_vm14, %v889_v17 }
  0x90   : >>> { %v791_v30 = vunpack.i.h.bf16 %v789_v28  ;;  %v790_v31 = vunpack.i.l.bf16 %v789_v28  ;;  %v801_v32 = vunpack.i.h.bf16 %v799_v29  ;;  %v800_v33 = vunpack.i.l.bf16 %v799_v29 }
  0x91   : >>> { %v356_v34 = vsel %vm355_vm1, %v260_v13, %v315_v26  ;;  %v357_v35 = vsel %vm355_vm1, %v691_v14, %v316_v27  ;;  %vm396_vm0 = vcmask 850944   ;;  %vm382_vm1 = vcmask 982016  }
  0x92   : >>> { %v276_v38 = vsel %vm275_vm3, %v790_v31, %v791_v30  ;;  %v277_v39 = vsel %vm275_vm3, %v791_v30, %v790_v31  ;;  %v290_v40 = vsel %vm289_vm5, %v800_v33, %v801_v32  ;;  %v291_v41 = vsel %vm289_vm5, %v801_v32, %v800_v33 }
  0x93   : >>> { %v321_v42 = vrot.slane %v276_v38, 6  ;;  %v322_v43 = vrot.slane %v277_v39, 6  ;;  %v333_v44 = vrot.slane %v290_v40, 4  ;;  %v334_v45 = vrot.slane %v291_v41, 4  ;;  %v804_v46 = vpop.permute.xlu0 %803  ;;  %v809_v47 = vpop.permute.xlu1 %808 }
  0x94   : >>> { %v806_v48 = vunpack.i.h.bf16 %v804_v46  ;;  %v805_v49 = vunpack.i.l.bf16 %v804_v46  ;;  %v811_v50 = vunpack.i.h.bf16 %v809_v47  ;;  %v810_v51 = vunpack.i.l.bf16 %v809_v47 }
  0x95   : >>> { %v359_v52 = vsel %vm358_vm4, %v356_v34, %v321_v42  ;;  %v360_v53 = vsel %vm358_vm4, %v357_v35, %v322_v43  ;;  %vm408_vm2 = vcmask 261120  }
  0x96   : >>> { %v362_v54 = vsel %vm361_vm6, %v359_v52, %v327_v36  ;;  %v363_v55 = vsel %vm361_vm6, %v360_v53, %v328_v37  ;;  %v297_v56 = vsel %vm296_vm8, %v805_v49, %v806_v48  ;;  %v298_v57 = vsel %vm296_vm8, %v806_v48, %v805_v49  ;;  %v832_v37 = vld [vmem:[%s1076_s1] sm:$0xff]  }
  0x97   : >>> { %v365_v58 = vsel %vm364_vm7, %v362_v54, %v333_v44  ;;  %v366_v59 = vsel %vm364_vm7, %v363_v55, %v334_v45  ;;  %v339_v60 = vrot.slane %v297_v56, 3  ;;  %v340_v61 = vrot.slane %v298_v57, 3  ;;  %v814_v62 = vpop.permute.xlu0 %813 }
  0x98   : >>> { %v304_v63 = vsel %vm303_vm10, %v810_v51, %v811_v50  ;;  %v305_v0 = vsel %vm303_vm10, %v811_v50, %v810_v51  ;;  %v816_v1 = vunpack.i.h.bf16 %v814_v62  ;;  %v815_v2 = vunpack.i.l.bf16 %v814_v62 }
  0x99   : >>> { %v368_v4 = vsel %vm367_vm9, %v365_v58, %v339_v60  ;;  %v345_v5 = vrot.slane %v304_v63, 2  ;;  %v346_v6 = vrot.slane %v305_v0, 2  ;;  %v369_v7 = vsel %vm367_vm9, %v366_v59, %v340_v61 }
  0x9a   : >>> { %v311_v13 = vsel %vm310_vm11, %v815_v2, %v816_v1  ;;  %v312_v14 = vsel %vm310_vm11, %v816_v1, %v815_v2 }
  0x9b   : >>> { %v351_v15 = vrot.slane %v311_v13, 1  ;;  %v352_v16 = vrot.slane %v312_v14, 1  ;;  %v371_v18 = vsel %vm370_vm12, %v368_v4, %v345_v5  ;;  %v372_v19 = vsel %vm370_vm12, %v369_v7, %v346_v6 }
  0x9c   : >>> { %v498_v14 = vstv %s694_s23 }
  0x9d   : >>> { %v374_v20 = vsel %vm373_vm13, %v371_v18, %v351_v15  ;;  %v375_v21 = vsel %vm373_vm13, %v372_v19, %v352_v16 }
  0x9e   : >>> { %v822_v22 = vpack.i.bf16 %v375_v21, %v374_v20 }
  0xa0   : >>> { %823 = vrot.lane.b32.xlu0 %v822_v22, %s891_s16  ;;  %818 = vrot.lane.b32.xlu1 %v822_v22, %s892_s17 }
  0xa4   : >>> { %828 = vrot.lane.b32.xlu1 %v822_v22, %s893_s19 }
 0x112   : >>> { %v824_v23 = vpop.permute.xlu0 %823  ;;  %v819_v24 = vpop.permute.xlu1 %818 }
 0x113   : >>> { %v826_v25 = vunpack.i.h.bf16 %v824_v23  ;;  %v825_v26 = vunpack.i.l.bf16 %v824_v23  ;;  %v821_v27 = vunpack.i.h.bf16 %v819_v24  ;;  %v820_v28 = vunpack.i.l.bf16 %v819_v24 }
 0x115   : >>> { %v390_v29 = vsel %vm389_vm15, %v820_v28, %v821_v27  ;;  %v397_v30 = vsel %vm396_vm0, %v825_v26, %v826_v25  ;;  %v894_v25 = vmov (%p252_p4), 0.0  }
 0x116   : >>> { %v829_v31 = vpop.permute.xlu1 %828  ;;  %v402_v32 = vpack.c.bf16 %v397_v30, %v390_v29 }
 0x117   : >>> { %v831_v33 = vunpack.i.h.bf16 %v829_v31  ;;  %v830_v34 = vunpack.i.l.bf16 %v829_v31 }
 0x118   : >>> { %703 = vmatpush3.bf16.msra.mxu0 %v402_v32 }
 0x119   : >>> { %704 = vmatprep.subr.bf16.mxu0 %v889_v17  ;;  %v383_v35 = vsel %vm382_vm1, %v830_v34, %v831_v33 }
 0x11a   : >>> { %v401_v36 = vpack.c.bf16 %v383_v35, %v374_v20 }
 0x11c   : >>> { %705 = vmatpush3.bf16.msra.mxu0 %v401_v36 }
 0x11f   : >>> { %707 = vmatmul.mubr.msk.bf16.vlgmr.msra.gmra.mxu0 %vm408_vm2, %v832_v37 }
 0x1df   : >>> { %v446_v38 = vpop.f32.mrf.mxu0 }
 0x1e1   : >>> { %v708_v39 = vpop.f32.mrf.mxu0 }
 0x1e3   : >>> { %v449_v40 = vpop.f32.mrf.mxu0 }
 0x1e4   : >>> { %v453_v41 = vmax.f32 %v446_v38, %v449_v40 }
 0x1e5   : >>> { %v709_v42 = vpop.f32.mrf.mxu0 }
 0x1e6   : >>> { %454 = vmax.xlane.f32.xlu0 %v453_v41 }
 0x26f   : >>> { %v455_v43 = vpop.xlane.xlu0 %454 }
 0x270   : >>> { %v456_v44 = vrot.slane %v455_v43, 4 }
 0x272   : >>> { %v457_v45 = vmax.f32 %v455_v43, %v456_v44 }
 0x274   : >>> { %v458_v46 = vrot.slane %v457_v45, 2 }
 0x276   : >>> { %v459_v47 = vmax.f32 %v457_v45, %v458_v46 }
 0x278   : >>> { %v460_v48 = vrot.slane %v459_v47, 1 }
 0x27a   : >>> { %v461_v49 = vmax.f32 %v459_v47, %v460_v48 }
 0x27c   : >>> { %710 = vpush %v461_v49 }
 0x2ad   : >>> { %s711_s22 = spop %710 }
 0x2ae   : >>> { %v463_v50 = vstv %s711_s22 }
 0x2af   : >>> { %vm464_vm3 = vcmp.eq.f32.partialorder %v446_v38, %v463_v50  ;;  %vm465_vm4 = vcmp.eq.f32.partialorder %v449_v40, %v463_v50  ;;  %vm501_vm14 = vcmp.eq.f32.partialorder %v463_v50, %v875_v12  ;;  %vm500_vm0 = vcmp.gt.f32.partialorder %v463_v50, %v875_v12 }
 0x2b0   : >>> { %v466_v51 = vsel %vm464_vm3, %v949_v8, 2048  ;;  %v467_v52 = vsel %vm465_vm4, %v952_v9, 2048  ;;  %vm562_vm3 = vcmp.eq.s32.totalorder (%p252_p4), %v933_v3, 1  ;;  %vm561_vm4 = vcmp.eq.s32.totalorder (%p252_p4), %v933_v3, 0 }
 0x2b1   : >>> { %vm468_vm5 = vcmp.lt.s32.totalorder %v466_v51, %v467_v52 }
 0x2b2   : >>> { %v469_v53 = vsel %vm468_vm5, %v466_v51, %v467_v52  ;;  %vm567_vm5 = vcmask (%p252_p4), 253952  }
 0x2b3   : >>> { %v471_v54 = vshra.s32 %v469_v53, 16  ;;  %v470_v56 = vand.u32 65535, %v469_v53 }
 0x2b5   : >>> { %v473_v55 = vcvt.s32.f32 %v471_v54  ;;  %v472_v58 = vcvt.s32.f32 %v470_v56 }
 0x2b7   : >>> { %474 = vmin.xlane.f32.xlu1 %v473_v55 }
 0x340   : >>> { %v475_v57 = vpop.xlane.xlu1 %474 }
 0x341   : >>> { %vm476_vm6 = vcmp.eq.f32.partialorder %v473_v55, %v475_v57  ;;  %v481_v60 = vcvt.f32.s32 %v475_v57 }
 0x342   : >>> { %v477_v59 = vsel %vm476_vm6, %v472_v58, inf }
 0x343   : >>> { %478 = vmin.xlane.f32.xlu0 %v477_v59  ;;  %v482_v62 = vshll.u32 %v481_v60, 16 }
 0x3cc   : >>> { %v479_v61 = vpop.xlane.xlu0 %478 }
 0x3cd   : >>> { %v480_v63 = vcvt.f32.s32 %v479_v61 }
 0x3cf   : >>> { %v483_v0 = vadd.s32 %v482_v62, %v480_v63 }
 0x3d1   : >>> { %v484_v1 = vrot.slane %v483_v0, 4 }
 0x3d3   : >>> { %vm485_vm7 = vcmp.lt.s32.totalorder %v483_v0, %v484_v1 }
 0x3d4   : >>> { %v486_v2 = vsel %vm485_vm7, %v483_v0, %v484_v1 }
 0x3d5   : >>> { %v487_v4 = vrot.slane %v486_v2, 2 }
 0x3d7   : >>> { %vm488_vm8 = vcmp.lt.s32.totalorder %v486_v2, %v487_v4 }
 0x3d8   : >>> { %v489_v5 = vsel %vm488_vm8, %v486_v2, %v487_v4 }
 0x3d9   : >>> { %v490_v6 = vrot.slane %v489_v5, 1 }
 0x3db   : >>> { %vm491_vm9 = vcmp.lt.s32.totalorder %v489_v5, %v490_v6 }
 0x3dc   : >>> { %v492_v7 = vsel %vm491_vm9, %v489_v5, %v490_v6 }
 0x3dd   : >>> { %712 = vpush %v492_v7 }
 0x40e   : >>> { %s713_s24 = spop %712 }
 0x40f   : >>> { %v494_v13 = vstv %s713_s24 }
 0x410   : >>> { %v495_v15 = vshra.s32 %v494_v13, 7  ;;  %v496_v16 = vand.u32 127, %v494_v13 }
 0x412   : >>> { %v499_v17 = vadd.s32 %v498_v14, %v496_v16  ;;  %vm503_vm10 = vcmp.eq.s32.totalorder %v495_v15, %v871_v11  ;;  %vm502_vm12 = vcmp.lt.s32.totalorder %v495_v15, %v871_v11 }
 0x414   : >>> { %vm504_vm11 = vcmp.lt.s32.totalorder %v499_v17, %v867_v10 }
 0x415   : >>> { %vm505_vm13 = vmand %vm503_vm10, %vm504_vm11 }
 0x416   : >>> { %vm506_vm15 = vmor %vm502_vm12, %vm505_vm13  ;;  %254 = sbr.rel (!%p252_p4) target bundleno = 21 (0x15), region = 99 }
 0x417   : >>> { %vm507_vm1 = vmand %vm501_vm14, %vm506_vm15 }
 0x418   : >>> { %vm508_vm2 = vmor %vm500_vm0, %vm507_vm1 }
 0x419   : >>> { %v509_v18 = vsel %vm508_vm2, %v463_v50, %v875_v12   ;;  %v510_v19 = vsel %vm508_vm2, %v495_v15, %v871_v11   ;;  %v511_v20 = vsel %vm508_vm2, %v499_v17, %v867_v10  }
 0x41a   : >>> { %v1081_v10 = vmov %v511_v20  ;;  %v1082_v11 = vmov %v510_v19  ;;  %v1083_v12 = vmov %v509_v18  ;;  %714 = vpush (%p252_p4), %v509_v18 }
 0x41b   : >> { %716 = vpush %v510_v19 }
 0x41c   : >> { %718 = vpush %v511_v20 }
 0x44b   : >> { %s1046_s25 = spop %714 }
 0x44c   : >> { %s717_s26 = spop %716  ;;  %p550_p6 = scmp.lt.f32.partialorder %s1046_s25, 0.0  ;;  %v517_v11 = vstv %s1046_s25 }
 0x44d   : >> { %p553_p5 = scmp.eq.s32.totalorder %s717_s26, 0  ;;  %s1048_s28 = spop %718 }
 0x44e   : >> { %p547_p7 = scmp.eq.s32.totalorder %s1048_s28, 0  ;;  %p549_p8 = scmp.gt.f32.partialorder %s1046_s25, 0.0 }
 0x44f   : >> { %s554_s29 = scalar_select %p553_p5, 1, 0 }
 0x450   : >> { %s515_s9 = scalar_lea.vmem %s1077_s2, %s717_s26  ;;  %s520_s14 = sand.u32 127, %s1048_s28 }
 0x451   : >> { %s1087_s29 = smov (!%p550_p6, %s554_s29), 0  ;;  %v516_v10 = vld [vmem:[%s515_s9] sm:$0x1]  ;;  %s521_s16 = sand.u32 255, %s520_s14  }
 0x452   : >> { %s548_s10 = scalar_select %p547_p7, 1, 0  ;;  %v518_v12 = vmul.f32 %v517_v11, %v516_v10 }
 0x453   : >> { %s1089_s26 = smov (!%p549_p8, %s717_s26), %s1087_s29  ;;  %s522_s19 = sand.u32 127, %s521_s16  }
 0x454   : >> { %s1091_s10 = smov (!%p550_p6, %s548_s10), 0  ;;  %s559_s13 = scalar_lea.vmem %s1078_s3, %s1089_s26  ;;  %524 = vrot.lane.b32.xlu0 %v518_v12, %s522_s19  ;;  %v528_v27 = vstv %s522_s19 }
 0x455   : >> { %s552_s15 = scalar_select %p549_p8, %s1048_s28, %s1091_s10  ;;  %v560_v21 = vld [vmem:[%s559_s13] sm:$0x1]  ;;  %vm529_vm6 = vcmp.lt.s32.totalorder %v933_v3, %v528_v27 }
 0x456   : >> { %v563_v23 = vsel %vm562_vm3, %v517_v11, %v560_v21  ;;  %s523_s22 = sshrl.u32 %s521_s16, 7  ;;  %s519_s24 = sshra.s32 %s1048_s28, 7 }
 0x457   : >> { %s557_s17 = scvt.s32.f32 %s552_s15  ;;  %s532_s23 = sand.u32 1, %s523_s22 }
 0x458   : >> { %526 = vrot.lane.b32.xlu0 %v894_v25, %s522_s19  ;;  %v533_v28 = vstv %s532_s23  ;;  %s537_s25 = scalar_lea.vmem [#allocation2], %s519_s24 }
 0x459   : >> { %s558_s20 = smul.f32 0.078431375, %s557_s17  ;;  %vm534_vm7 = vcmp.ne.s32.totalorder %v533_v28, 0  ;;  %v538_v34 = vld [vmem:[%s537_s25] sm:$0x1] }
 0x45a   : >> { %v695_v35 = vld [vmem:[%s537_s25 + $0x1] sm:$0x1] }
 0x45b   : >> { %v564_v22 = vstv %s558_s20 }
 0x45c   : >> { %v565_v24 = vsel %vm561_vm4, %v564_v22, %v563_v23 }
 0x45d   : >> { %568 = vst.msk [vmem:[%s566_s21] sm:$0x1] %vm567_vm5, %v565_v24 }
 0x4c6   : >> { %v525_v26 = vpop.permute.xlu0 %524 }
 0x4ca   : >> { %v527_v29 = vpop.permute.xlu0 %526 }
 0x4cb   : >> { %v530_v30 = vsel %vm529_vm6, %v525_v26, %v527_v29  ;;  %v531_v31 = vsel %vm529_vm6, %v527_v29, %v525_v26 }
 0x4cc   : >> { %v535_v32 = vsel %vm534_vm7, %v530_v30, %v531_v31  ;;  %v536_v33 = vsel %vm534_vm7, %v531_v31, %v530_v30  ;;  %248 = sbr.rel (!%p246_p9) target bundleno = 20 (0x14), region = 110 }
 0x4cd   : >> { %v539_v36 = vsub.f32 %v538_v34, %v535_v32  ;;  %v544_v37 = vsub.f32 %v695_v35, %v536_v33 }
 0x4cf   : >> { %540 = vst [vmem:[%s537_s25] sm:$0x1] %v539_v36  ;;  %696 = vst [vmem:[%s537_s25 + $0x1] sm:$0x1] %v544_v37 }
 0x4d0   : >> { %546 = vst [vmem:[#allocation2 + $0x2] sm:$0x1] %v894_v25 }
 0x4d6   : > { %v569_v38 = vld [vmem:[#allocation2] sm:$0x3] }
 0x4d7   : > { %570 = vst [vmem:[%s946_s30] sm:$0x3] %v569_v38 }
 0x4d8 PF: > { %s16_s18 = sadd.s32 1, %s859_s18  }
 0x4d9   : > { %p13_p10 = scmp.ge.s32.totalorder %s16_s18, 6  }
 0x4db   :  { %15 = sbr.rel (!%p13_p10) target bundleno = 1 (0x1), region = 121 }

</bundles_post_ra>
